<compile_context>
chip_gen: v5e
topology: v5e:2x2
jax: 0.10.0
libtpu: 0.0.40
codegen_flags: <defaults>
</compile_context>

<pallas_src>
import jax
import jax.numpy as jnp
from jax import lax
from jax.experimental import pallas as pl
from jax.experimental.pallas import tpu as pltpu

# ---- small, shape-consistent hyperparameters ----
VOCAB = 128    # vocab.number_of_ids()  (== lane width -> dense logits)
EMBDIM = 32    # embdim
HDIM = 32      # hdim
B = 2          # batch
L = 8          # sequence length
G3 = 3 * HDIM  # stacked gates [r | z | n]


def rnn_kernel(x_ref, gold_ref, ewi_ref, bi_ref, wh_ref, bh_ref,
               wout_ref, bout_ref, loss_ref, acc_ref, logits_ref, xg_ref):
    # --- embedding lookup fused with the input-gate projection (one matmul) ---
    # ids are time-major: row t*B + b.  Out-of-range ids would give a zero
    # embedding; ids are assumed in [0, VOCAB).
    ids = x_ref[...]                                               # (L*B, 1) i32
    vocab_iota = lax.broadcasted_iota(jnp.int32, (L * B, VOCAB), 1)
    onehot = (ids == vocab_iota).astype(jnp.float32)               # (L*B, V)
    # ewi = emb @ W_ih (precomputed outside the kernel); bias added once here.
    xg_ref[...] = jnp.dot(onehot, ewi_ref[...],
                          preferred_element_type=jnp.float32) + bi_ref[...]

    # --- hoisted loop invariants ---
    wh = wh_ref[...]                                               # (H, 3H)
    bh = jnp.broadcast_to(bh_ref[...], (B, G3))                    # (B, 3H)

    # --- GRU recurrence: exactly one fused MXU matmul per step ---
    def step(t, h):
        xg = xg_ref[pl.ds(t * B, B), :]                            # (B, 3H)
        hg = jnp.dot(h, wh, preferred_element_type=jnp.float32) + bh
        r = jax.nn.sigmoid(xg[:, :HDIM] + hg[:, :HDIM])
        z = jax.nn.sigmoid(xg[:, HDIM:2 * HDIM] + hg[:, HDIM:2 * HDIM])
        n = jnp.tanh(xg[:, 2 * HDIM:] + r * hg[:, 2 * HDIM:])
        return (1.0 - z) * n + z * h

    h0 = jnp.zeros((B, HDIM), jnp.float32)
    h = lax.fori_loop(0, L, step, h0, unroll=True)                 # (B, H)

    # --- output head: outlin(final)  (lane-dense, VOCAB == 128) ---
    logits = jnp.dot(h, wout_ref[...],
                     preferred_element_type=jnp.float32) + bout_ref[...]
    logits_ref[...] = logits                                       # (B, V)

    # --- CrossEntropyLoss(reduction='mean') + ClassificationAccuracy ---
    gold = gold_ref[...]                                           # (B, 1) i32
    lane = lax.broadcasted_iota(jnp.int32, (B, VOCAB), 1)
    gold_onehot = (gold == lane).astype(jnp.float32)
    row_max = jnp.max(logits, axis=-1, keepdims=True)              # (B, 1)
    lse = row_max + jnp.log(jnp.sum(jnp.exp(logits - row_max),
                                    axis=-1, keepdims=True))
    gold_logit = jnp.sum(logits * gold_onehot, axis=-1, keepdims=True)
    per_ex = lse - gold_logit                                      # (B, 1)
    loss_ref[...] = jnp.sum(per_ex, axis=0, keepdims=True) * (1.0 / B)

    # argmax (first max index) via a float lane-min; compare to gold.
    lane_f = lane.astype(jnp.float32)
    argmax = jnp.min(jnp.where(logits == row_max, lane_f, float(VOCAB)),
                     axis=-1, keepdims=True)                       # (B, 1)
    correct = (argmax == gold.astype(jnp.float32)).astype(jnp.float32)
    acc_ref[...] = jnp.sum(correct, axis=0, keepdims=True) * (1.0 / B)


@jax.jit
def rnnmodel_forward(x, gold, emb, w_ih, b_ih, w_hh, b_hh, w_out, b_out):
    # Host/XLA-side precompute: fold the embedding table into the stacked
    # input-gate weights so the kernel does one one-hot matmul for the whole
    # sequence (perf review: fewer dependent matmuls on the serial chain).
    ewi = jnp.dot(emb, w_ih, preferred_element_type=jnp.float32)   # (V, 3H)
    x_tm = x.T.reshape(L * B, 1).astype(jnp.int32)                 # time-major ids
    gold2 = gold.reshape(B, 1).astype(jnp.int32)
    vmem = pl.BlockSpec(memory_space=pltpu.MemorySpace.VMEM)
    loss, acc, logits = pl.pallas_call(
        rnn_kernel,
        out_shape=(jax.ShapeDtypeStruct((1, 1), jnp.float32),      # loss
                   jax.ShapeDtypeStruct((1, 1), jnp.float32),      # acc
                   jax.ShapeDtypeStruct((B, VOCAB), jnp.float32)), # logits
        in_specs=[vmem] * 8,
        out_specs=(vmem, vmem, vmem),
        scratch_shapes=[pltpu.VMEM((L * B, G3), jnp.float32)],     # x-side gates
    )(x_tm, gold2, ewi, b_ih, w_hh, b_hh, w_out, b_out)
    return loss[0, 0], acc[0, 0], logits


def rnnmodel_ref(x, gold, emb, w_ih, b_ih, w_hh, b_hh, w_out, b_out):
    """Pure-JAX reference of the same eval-mode forward semantics."""
    embs = emb[x]                                                  # (B, L, E)
    h = jnp.zeros((B, HDIM), jnp.float32)
    for t in range(L):
        xg = embs[:, t, :] @ w_ih + b_ih[0]
        hg = h @ w_hh + b_hh[0]
        r = jax.nn.sigmoid(xg[:, :HDIM] + hg[:, :HDIM])
        z = jax.nn.sigmoid(xg[:, HDIM:2 * HDIM] + hg[:, HDIM:2 * HDIM])
        n = jnp.tanh(xg[:, 2 * HDIM:] + r * hg[:, 2 * HDIM:])
        h = (1.0 - z) * n + z * h
    logits = h @ w_out + b_out[0]
    lse = jax.scipy.special.logsumexp(logits, axis=-1)
    gold_logit = jnp.take_along_axis(logits, gold[:, None], axis=-1)[:, 0]
    loss = jnp.mean(lse - gold_logit)
    acc = jnp.mean((jnp.argmax(logits, axis=-1) == gold).astype(jnp.float32))
    return loss, acc, logits


def make_params(key):
    ks = jax.random.split(key, 7)
    s_in = 1.0 / jnp.sqrt(EMBDIM)
    s_h = 1.0 / jnp.sqrt(HDIM)
    emb = jax.random.normal(ks[0], (VOCAB, EMBDIM), jnp.float32)          # nn.Embedding
    # GRU weights stacked along the output axis as [r | z | n]  (fused gates)
    w_ih = jax.random.normal(ks[1], (EMBDIM, G3), jnp.float32) * s_in     # weight_ih^T
    b_ih = jax.random.normal(ks[2], (1, G3), jnp.float32) * s_h           # bias_ih
    w_hh = jax.random.normal(ks[3], (HDIM, G3), jnp.float32) * s_h        # weight_hh^T
    b_hh = jax.random.normal(ks[4], (1, G3), jnp.float32) * s_h           # bias_hh
    w_out = jax.random.normal(ks[5], (HDIM, VOCAB), jnp.float32) * s_h    # outlin weight^T
    b_out = jax.random.normal(ks[6], (1, VOCAB), jnp.float32) * 0.01      # outlin bias
    return emb, w_ih, b_ih, w_hh, b_hh, w_out, b_out


if __name__ == "__main__":
    key = jax.random.PRNGKey(0)
    k_x, k_g, k_p = jax.random.split(key, 3)
    x = jax.random.randint(k_x, (B, L), 0, VOCAB, dtype=jnp.int32)
    gold = jax.random.randint(k_g, (B,), 0, VOCAB, dtype=jnp.int32)
    params = make_params(k_p)

    loss, acc, logits = rnnmodel_forward(x, gold, *params)
    jax.block_until_ready((loss, acc, logits))

    loss_r, acc_r, logits_r = rnnmodel_ref(x, gold, *params)
    assert logits.shape == (B, VOCAB)
    assert jnp.allclose(logits, logits_r, atol=1e-4, rtol=1e-4), "logits mismatch"
    assert jnp.allclose(loss, loss_r, atol=1e-4, rtol=1e-4), "loss mismatch"
    assert jnp.allclose(acc, acc_r, atol=1e-6), "acc mismatch"

    print("KERNEL_OK")
</pallas_src>

<mosaic_0001>
module attributes {stable_mosaic.version = 11 : i64} {
  func.func @rnn_kernel(%arg0: memref<16x1xi32, #tpu.memory_space<vmem>>, %arg1: memref<2x1xi32, #tpu.memory_space<vmem>>, %arg2: memref<128x96xf32, #tpu.memory_space<vmem>>, %arg3: memref<1x96xf32, #tpu.memory_space<vmem>>, %arg4: memref<32x96xf32, #tpu.memory_space<vmem>>, %arg5: memref<1x96xf32, #tpu.memory_space<vmem>>, %arg6: memref<32x128xf32, #tpu.memory_space<vmem>>, %arg7: memref<1x128xf32, #tpu.memory_space<vmem>>, %arg8: memref<1x1xf32, #tpu.memory_space<vmem>>, %arg9: memref<1x1xf32, #tpu.memory_space<vmem>>, %arg10: memref<2x128xf32, #tpu.memory_space<vmem>>, %arg11: memref<16x96xf32, #tpu.memory_space<vmem>>) attributes {dimension_semantics = [], scalar_prefetch = 0 : i64, scratch_operands = 1 : i64, tpu.core_type = #tpu.core_type<tc>} {
    %c0 = arith.constant 0 : index
    %c0_0 = arith.constant 0 : index
    %0 = vector.load %arg0[%c0, %c0_0] : memref<16x1xi32, #tpu.memory_space<vmem>>, vector<16x1xi32>
    %1 = tpu.iota {dimensions = array<i32: 1>} : vector<16x128xi32>
    %2 = vector.broadcast %0 : vector<16x1xi32> to vector<16x128xi32>
    %3 = arith.cmpi eq, %2, %1 : vector<16x128xi32>
    %4 = arith.extui %3 : vector<16x128xi1> to vector<16x128xi32>
    %5 = arith.sitofp %4 : vector<16x128xi32> to vector<16x128xf32>
    %c0_1 = arith.constant 0 : index
    %c0_2 = arith.constant 0 : index
    %6 = vector.load %arg2[%c0_1, %c0_2] : memref<128x96xf32, #tpu.memory_space<vmem>>, vector<128x96xf32>
    %cst = arith.constant dense<0.000000e+00> : vector<16x96xf32>
    %7 = tpu.matmul %5, %6, %cst {dimension_numbers = #tpu.dot_dimension_numbers<[1], [0], [0], [1], [0, 0, 1, 1], [], []>} : vector<16x128xf32>, vector<128x96xf32>, vector<16x96xf32> -> vector<16x96xf32>
    %c0_3 = arith.constant 0 : index
    %c0_4 = arith.constant 0 : index
    %8 = vector.load %arg3[%c0_3, %c0_4] : memref<1x96xf32, #tpu.memory_space<vmem>>, vector<1x96xf32>
    %9 = vector.broadcast %8 : vector<1x96xf32> to vector<16x96xf32>
    %10 = arith.addf %7, %9 : vector<16x96xf32>
    %c0_5 = arith.constant 0 : index
    %c0_6 = arith.constant 0 : index
    %11 = vector.load %arg11[%c0_5, %c0_6] : memref<16x96xf32, #tpu.memory_space<vmem>>, vector<16x96xf32>
    tpu.vector_store %arg11[%c0_5, %c0_6], %10 {strides = array<i32>} : memref<16x96xf32, #tpu.memory_space<vmem>>, vector<16x96xf32>,
    %c0_7 = arith.constant 0 : index
    %c0_8 = arith.constant 0 : index
    %12 = vector.load %arg4[%c0_7, %c0_8] : memref<32x96xf32, #tpu.memory_space<vmem>>, vector<32x96xf32>
    %c0_9 = arith.constant 0 : index
    %c0_10 = arith.constant 0 : index
    %13 = vector.load %arg5[%c0_9, %c0_10] : memref<1x96xf32, #tpu.memory_space<vmem>>, vector<1x96xf32>
    %14 = vector.shape_cast %13 : vector<1x96xf32> to vector<1x96xf32>
    %15 = vector.broadcast %14 : vector<1x96xf32> to vector<2x96xf32>
    %cst_11 = arith.constant 0.000000e+00 : f32
    %16 = vector.broadcast %cst_11 : f32 to vector<2x32xf32>
    %c0_i32 = arith.constant 0 : i32
    %c2_i32 = arith.constant 2 : i32
    %17 = arith.muli %c0_i32, %c2_i32 : i32
    %18 = arith.index_cast %17 : i32 to index
    %c0_12 = arith.constant 0 : index
    %19 = vector.load %arg11[%18, %c0_12] : memref<16x96xf32, #tpu.memory_space<vmem>>, vector<2x96xf32>
    %cst_13 = arith.constant dense<0.000000e+00> : vector<2x96xf32>
    %20 = tpu.matmul %16, %12, %cst_13 {dimension_numbers = #tpu.dot_dimension_numbers<[1], [0], [0], [1], [0, 0, 1, 1], [], []>} : vector<2x32xf32>, vector<32x96xf32>, vector<2x96xf32> -> vector<2x96xf32>
    %21 = arith.addf %20, %15 : vector<2x96xf32>
    %22 = vector.extract_strided_slice %19 {offsets = [0, 0], sizes = [2, 32], strides = [1, 1]} : vector<2x96xf32> to vector<2x32xf32>
    %23 = vector.extract_strided_slice %21 {offsets = [0, 0], sizes = [2, 32], strides = [1, 1]} : vector<2x96xf32> to vector<2x32xf32>
    %24 = arith.addf %22, %23 : vector<2x32xf32>
    %25 = arith.negf %24 : vector<2x32xf32>
    %26 = math.exp %25 : vector<2x32xf32>
    %cst_14 = arith.constant 1.000000e+00 : f32
    %27 = vector.broadcast %cst_14 : f32 to vector<2x32xf32>
    %28 = arith.addf %27, %26 : vector<2x32xf32>
    %29 = arith.divf %27, %28 : vector<2x32xf32>
    %30 = vector.extract_strided_slice %19 {offsets = [0, 32], sizes = [2, 32], strides = [1, 1]} : vector<2x96xf32> to vector<2x32xf32>
    %31 = vector.extract_strided_slice %21 {offsets = [0, 32], sizes = [2, 32], strides = [1, 1]} : vector<2x96xf32> to vector<2x32xf32>
    %32 = arith.addf %30, %31 : vector<2x32xf32>
    %33 = arith.negf %32 : vector<2x32xf32>
    %34 = math.exp %33 : vector<2x32xf32>
    %cst_15 = arith.constant 1.000000e+00 : f32
    %35 = vector.broadcast %cst_15 : f32 to vector<2x32xf32>
    %36 = arith.addf %35, %34 : vector<2x32xf32>
    %37 = arith.divf %35, %36 : vector<2x32xf32>
    %38 = vector.extract_strided_slice %19 {offsets = [0, 64], sizes = [2, 32], strides = [1, 1]} : vector<2x96xf32> to vector<2x32xf32>
    %39 = vector.extract_strided_slice %21 {offsets = [0, 64], sizes = [2, 32], strides = [1, 1]} : vector<2x96xf32> to vector<2x32xf32>
    %40 = arith.mulf %29, %39 : vector<2x32xf32>
    %41 = arith.addf %38, %40 : vector<2x32xf32>
    %42 = math.tanh %41 : vector<2x32xf32>
    %cst_16 = arith.constant 1.000000e+00 : f32
    %43 = vector.broadcast %cst_16 : f32 to vector<2x32xf32>
    %44 = arith.subf %43, %37 : vector<2x32xf32>
    %45 = arith.mulf %44, %42 : vector<2x32xf32>
    %46 = arith.mulf %37, %16 : vector<2x32xf32>
    %47 = arith.addf %45, %46 : vector<2x32xf32>
    %c1_i32 = arith.constant 1 : i32
    %c2_i32_17 = arith.constant 2 : i32
    %48 = arith.muli %c1_i32, %c2_i32_17 : i32
    %49 = arith.index_cast %48 : i32 to index
    %c0_18 = arith.constant 0 : index
    %50 = vector.load %arg11[%49, %c0_18] : memref<16x96xf32, #tpu.memory_space<vmem>>, vector<2x96xf32>
    %cst_19 = arith.constant dense<0.000000e+00> : vector<2x96xf32>
    %51 = tpu.matmul %47, %12, %cst_19 {dimension_numbers = #tpu.dot_dimension_numbers<[1], [0], [0], [1], [0, 0, 1, 1], [], []>} : vector<2x32xf32>, vector<32x96xf32>, vector<2x96xf32> -> vector<2x96xf32>
    %52 = arith.addf %51, %15 : vector<2x96xf32>
    %53 = vector.extract_strided_slice %50 {offsets = [0, 0], sizes = [2, 32], strides = [1, 1]} : vector<2x96xf32> to vector<2x32xf32>
    %54 = vector.extract_strided_slice %52 {offsets = [0, 0], sizes = [2, 32], strides = [1, 1]} : vector<2x96xf32> to vector<2x32xf32>
    %55 = arith.addf %53, %54 : vector<2x32xf32>
    %56 = arith.negf %55 : vector<2x32xf32>
    %57 = math.exp %56 : vector<2x32xf32>
    %cst_20 = arith.constant 1.000000e+00 : f32
    %58 = vector.broadcast %cst_20 : f32 to vector<2x32xf32>
    %59 = arith.addf %58, %57 : vector<2x32xf32>
    %60 = arith.divf %58, %59 : vector<2x32xf32>
    %61 = vector.extract_strided_slice %50 {offsets = [0, 32], sizes = [2, 32], strides = [1, 1]} : vector<2x96xf32> to vector<2x32xf32>
    %62 = vector.extract_strided_slice %52 {offsets = [0, 32], sizes = [2, 32], strides = [1, 1]} : vector<2x96xf32> to vector<2x32xf32>
    %63 = arith.addf %61, %62 : vector<2x32xf32>
    %64 = arith.negf %63 : vector<2x32xf32>
    %65 = math.exp %64 : vector<2x32xf32>
    %cst_21 = arith.constant 1.000000e+00 : f32
    %66 = vector.broadcast %cst_21 : f32 to vector<2x32xf32>
    %67 = arith.addf %66, %65 : vector<2x32xf32>
    %68 = arith.divf %66, %67 : vector<2x32xf32>
    %69 = vector.extract_strided_slice %50 {offsets = [0, 64], sizes = [2, 32], strides = [1, 1]} : vector<2x96xf32> to vector<2x32xf32>
    %70 = vector.extract_strided_slice %52 {offsets = [0, 64], sizes = [2, 32], strides = [1, 1]} : vector<2x96xf32> to vector<2x32xf32>
    %71 = arith.mulf %60, %70 : vector<2x32xf32>
    %72 = arith.addf %69, %71 : vector<2x32xf32>
    %73 = math.tanh %72 : vector<2x32xf32>
    %cst_22 = arith.constant 1.000000e+00 : f32
    %74 = vector.broadcast %cst_22 : f32 to vector<2x32xf32>
    %75 = arith.subf %74, %68 : vector<2x32xf32>
    %76 = arith.mulf %75, %73 : vector<2x32xf32>
    %77 = arith.mulf %68, %47 : vector<2x32xf32>
    %78 = arith.addf %76, %77 : vector<2x32xf32>
    %c2_i32_23 = arith.constant 2 : i32
    %c2_i32_24 = arith.constant 2 : i32
    %79 = arith.muli %c2_i32_23, %c2_i32_24 : i32
    %80 = arith.index_cast %79 : i32 to index
    %c0_25 = arith.constant 0 : index
    %81 = vector.load %arg11[%80, %c0_25] : memref<16x96xf32, #tpu.memory_space<vmem>>, vector<2x96xf32>
    %cst_26 = arith.constant dense<0.000000e+00> : vector<2x96xf32>
    %82 = tpu.matmul %78, %12, %cst_26 {dimension_numbers = #tpu.dot_dimension_numbers<[1], [0], [0], [1], [0, 0, 1, 1], [], []>} : vector<2x32xf32>, vector<32x96xf32>, vector<2x96xf32> -> vector<2x96xf32>
    %83 = arith.addf %82, %15 : vector<2x96xf32>
    %84 = vector.extract_strided_slice %81 {offsets = [0, 0], sizes = [2, 32], strides = [1, 1]} : vector<2x96xf32> to vector<2x32xf32>
    %85 = vector.extract_strided_slice %83 {offsets = [0, 0], sizes = [2, 32], strides = [1, 1]} : vector<2x96xf32> to vector<2x32xf32>
    %86 = arith.addf %84, %85 : vector<2x32xf32>
    %87 = arith.negf %86 : vector<2x32xf32>
    %88 = math.exp %87 : vector<2x32xf32>
    %cst_27 = arith.constant 1.000000e+00 : f32
    %89 = vector.broadcast %cst_27 : f32 to vector<2x32xf32>
    %90 = arith.addf %89, %88 : vector<2x32xf32>
    %91 = arith.divf %89, %90 : vector<2x32xf32>
    %92 = vector.extract_strided_slice %81 {offsets = [0, 32], sizes = [2, 32], strides = [1, 1]} : vector<2x96xf32> to vector<2x32xf32>
    %93 = vector.extract_strided_slice %83 {offsets = [0, 32], sizes = [2, 32], strides = [1, 1]} : vector<2x96xf32> to vector<2x32xf32>
    %94 = arith.addf %92, %93 : vector<2x32xf32>
    %95 = arith.negf %94 : vector<2x32xf32>
    %96 = math.exp %95 : vector<2x32xf32>
    %cst_28 = arith.constant 1.000000e+00 : f32
    %97 = vector.broadcast %cst_28 : f32 to vector<2x32xf32>
    %98 = arith.addf %97, %96 : vector<2x32xf32>
    %99 = arith.divf %97, %98 : vector<2x32xf32>
    %100 = vector.extract_strided_slice %81 {offsets = [0, 64], sizes = [2, 32], strides = [1, 1]} : vector<2x96xf32> to vector<2x32xf32>
    %101 = vector.extract_strided_slice %83 {offsets = [0, 64], sizes = [2, 32], strides = [1, 1]} : vector<2x96xf32> to vector<2x32xf32>
    %102 = arith.mulf %91, %101 : vector<2x32xf32>
    %103 = arith.addf %100, %102 : vector<2x32xf32>
    %104 = math.tanh %103 : vector<2x32xf32>
    %cst_29 = arith.constant 1.000000e+00 : f32
    %105 = vector.broadcast %cst_29 : f32 to vector<2x32xf32>
    %106 = arith.subf %105, %99 : vector<2x32xf32>
    %107 = arith.mulf %106, %104 : vector<2x32xf32>
    %108 = arith.mulf %99, %78 : vector<2x32xf32>
    %109 = arith.addf %107, %108 : vector<2x32xf32>
    %c3_i32 = arith.constant 3 : i32
    %c2_i32_30 = arith.constant 2 : i32
    %110 = arith.muli %c3_i32, %c2_i32_30 : i32
    %111 = arith.index_cast %110 : i32 to index
    %c0_31 = arith.constant 0 : index
    %112 = vector.load %arg11[%111, %c0_31] : memref<16x96xf32, #tpu.memory_space<vmem>>, vector<2x96xf32>
    %cst_32 = arith.constant dense<0.000000e+00> : vector<2x96xf32>
    %113 = tpu.matmul %109, %12, %cst_32 {dimension_numbers = #tpu.dot_dimension_numbers<[1], [0], [0], [1], [0, 0, 1, 1], [], []>} : vector<2x32xf32>, vector<32x96xf32>, vector<2x96xf32> -> vector<2x96xf32>
    %114 = arith.addf %113, %15 : vector<2x96xf32>
    %115 = vector.extract_strided_slice %112 {offsets = [0, 0], sizes = [2, 32], strides = [1, 1]} : vector<2x96xf32> to vector<2x32xf32>
    %116 = vector.extract_strided_slice %114 {offsets = [0, 0], sizes = [2, 32], strides = [1, 1]} : vector<2x96xf32> to vector<2x32xf32>
    %117 = arith.addf %115, %116 : vector<2x32xf32>
    %118 = arith.negf %117 : vector<2x32xf32>
    %119 = math.exp %118 : vector<2x32xf32>
    %cst_33 = arith.constant 1.000000e+00 : f32
    %120 = vector.broadcast %cst_33 : f32 to vector<2x32xf32>
    %121 = arith.addf %120, %119 : vector<2x32xf32>
    %122 = arith.divf %120, %121 : vector<2x32xf32>
    %123 = vector.extract_strided_slice %112 {offsets = [0, 32], sizes = [2, 32], strides = [1, 1]} : vector<2x96xf32> to vector<2x32xf32>
    %124 = vector.extract_strided_slice %114 {offsets = [0, 32], sizes = [2, 32], strides = [1, 1]} : vector<2x96xf32> to vector<2x32xf32>
    %125 = arith.addf %123, %124 : vector<2x32xf32>
    %126 = arith.negf %125 : vector<2x32xf32>
    %127 = math.exp %126 : vector<2x32xf32>
    %cst_34 = arith.constant 1.000000e+00 : f32
    %128 = vector.broadcast %cst_34 : f32 to vector<2x32xf32>
    %129 = arith.addf %128, %127 : vector<2x32xf32>
    %130 = arith.divf %128, %129 : vector<2x32xf32>
    %131 = vector.extract_strided_slice %112 {offsets = [0, 64], sizes = [2, 32], strides = [1, 1]} : vector<2x96xf32> to vector<2x32xf32>
    %132 = vector.extract_strided_slice %114 {offsets = [0, 64], sizes = [2, 32], strides = [1, 1]} : vector<2x96xf32> to vector<2x32xf32>
    %133 = arith.mulf %122, %132 : vector<2x32xf32>
    %134 = arith.addf %131, %133 : vector<2x32xf32>
    %135 = math.tanh %134 : vector<2x32xf32>
    %cst_35 = arith.constant 1.000000e+00 : f32
    %136 = vector.broadcast %cst_35 : f32 to vector<2x32xf32>
    %137 = arith.subf %136, %130 : vector<2x32xf32>
    %138 = arith.mulf %137, %135 : vector<2x32xf32>
    %139 = arith.mulf %130, %109 : vector<2x32xf32>
    %140 = arith.addf %138, %139 : vector<2x32xf32>
    %c4_i32 = arith.constant 4 : i32
    %c2_i32_36 = arith.constant 2 : i32
    %141 = arith.muli %c4_i32, %c2_i32_36 : i32
    %142 = arith.index_cast %141 : i32 to index
    %c0_37 = arith.constant 0 : index
    %143 = vector.load %arg11[%142, %c0_37] : memref<16x96xf32, #tpu.memory_space<vmem>>, vector<2x96xf32>
    %cst_38 = arith.constant dense<0.000000e+00> : vector<2x96xf32>
    %144 = tpu.matmul %140, %12, %cst_38 {dimension_numbers = #tpu.dot_dimension_numbers<[1], [0], [0], [1], [0, 0, 1, 1], [], []>} : vector<2x32xf32>, vector<32x96xf32>, vector<2x96xf32> -> vector<2x96xf32>
    %145 = arith.addf %144, %15 : vector<2x96xf32>
    %146 = vector.extract_strided_slice %143 {offsets = [0, 0], sizes = [2, 32], strides = [1, 1]} : vector<2x96xf32> to vector<2x32xf32>
    %147 = vector.extract_strided_slice %145 {offsets = [0, 0], sizes = [2, 32], strides = [1, 1]} : vector<2x96xf32> to vector<2x32xf32>
    %148 = arith.addf %146, %147 : vector<2x32xf32>
    %149 = arith.negf %148 : vector<2x32xf32>
    %150 = math.exp %149 : vector<2x32xf32>
    %cst_39 = arith.constant 1.000000e+00 : f32
    %151 = vector.broadcast %cst_39 : f32 to vector<2x32xf32>
    %152 = arith.addf %151, %150 : vector<2x32xf32>
    %153 = arith.divf %151, %152 : vector<2x32xf32>
    %154 = vector.extract_strided_slice %143 {offsets = [0, 32], sizes = [2, 32], strides = [1, 1]} : vector<2x96xf32> to vector<2x32xf32>
    %155 = vector.extract_strided_slice %145 {offsets = [0, 32], sizes = [2, 32], strides = [1, 1]} : vector<2x96xf32> to vector<2x32xf32>
    %156 = arith.addf %154, %155 : vector<2x32xf32>
    %157 = arith.negf %156 : vector<2x32xf32>
    %158 = math.exp %157 : vector<2x32xf32>
    %cst_40 = arith.constant 1.000000e+00 : f32
    %159 = vector.broadcast %cst_40 : f32 to vector<2x32xf32>
    %160 = arith.addf %159, %158 : vector<2x32xf32>
    %161 = arith.divf %159, %160 : vector<2x32xf32>
    %162 = vector.extract_strided_slice %143 {offsets = [0, 64], sizes = [2, 32], strides = [1, 1]} : vector<2x96xf32> to vector<2x32xf32>
    %163 = vector.extract_strided_slice %145 {offsets = [0, 64], sizes = [2, 32], strides = [1, 1]} : vector<2x96xf32> to vector<2x32xf32>
    %164 = arith.mulf %153, %163 : vector<2x32xf32>
    %165 = arith.addf %162, %164 : vector<2x32xf32>
    %166 = math.tanh %165 : vector<2x32xf32>
    %cst_41 = arith.constant 1.000000e+00 : f32
    %167 = vector.broadcast %cst_41 : f32 to vector<2x32xf32>
    %168 = arith.subf %167, %161 : vector<2x32xf32>
    %169 = arith.mulf %168, %166 : vector<2x32xf32>
    %170 = arith.mulf %161, %140 : vector<2x32xf32>
    %171 = arith.addf %169, %170 : vector<2x32xf32>
    %c5_i32 = arith.constant 5 : i32
    %c2_i32_42 = arith.constant 2 : i32
    %172 = arith.muli %c5_i32, %c2_i32_42 : i32
    %173 = arith.index_cast %172 : i32 to index
    %c0_43 = arith.constant 0 : index
    %174 = vector.load %arg11[%173, %c0_43] : memref<16x96xf32, #tpu.memory_space<vmem>>, vector<2x96xf32>
    %cst_44 = arith.constant dense<0.000000e+00> : vector<2x96xf32>
    %175 = tpu.matmul %171, %12, %cst_44 {dimension_numbers = #tpu.dot_dimension_numbers<[1], [0], [0], [1], [0, 0, 1, 1], [], []>} : vector<2x32xf32>, vector<32x96xf32>, vector<2x96xf32> -> vector<2x96xf32>
    %176 = arith.addf %175, %15 : vector<2x96xf32>
    %177 = vector.extract_strided_slice %174 {offsets = [0, 0], sizes = [2, 32], strides = [1, 1]} : vector<2x96xf32> to vector<2x32xf32>
    %178 = vector.extract_strided_slice %176 {offsets = [0, 0], sizes = [2, 32], strides = [1, 1]} : vector<2x96xf32> to vector<2x32xf32>
    %179 = arith.addf %177, %178 : vector<2x32xf32>
    %180 = arith.negf %179 : vector<2x32xf32>
    %181 = math.exp %180 : vector<2x32xf32>
    %cst_45 = arith.constant 1.000000e+00 : f32
    %182 = vector.broadcast %cst_45 : f32 to vector<2x32xf32>
    %183 = arith.addf %182, %181 : vector<2x32xf32>
    %184 = arith.divf %182, %183 : vector<2x32xf32>
    %185 = vector.extract_strided_slice %174 {offsets = [0, 32], sizes = [2, 32], strides = [1, 1]} : vector<2x96xf32> to vector<2x32xf32>
    %186 = vector.extract_strided_slice %176 {offsets = [0, 32], sizes = [2, 32], strides = [1, 1]} : vector<2x96xf32> to vector<2x32xf32>
    %187 = arith.addf %185, %186 : vector<2x32xf32>
    %188 = arith.negf %187 : vector<2x32xf32>
    %189 = math.exp %188 : vector<2x32xf32>
    %cst_46 = arith.constant 1.000000e+00 : f32
    %190 = vector.broadcast %cst_46 : f32 to vector<2x32xf32>
    %191 = arith.addf %190, %189 : vector<2x32xf32>
    %192 = arith.divf %190, %191 : vector<2x32xf32>
    %193 = vector.extract_strided_slice %174 {offsets = [0, 64], sizes = [2, 32], strides = [1, 1]} : vector<2x96xf32> to vector<2x32xf32>
    %194 = vector.extract_strided_slice %176 {offsets = [0, 64], sizes = [2, 32], strides = [1, 1]} : vector<2x96xf32> to vector<2x32xf32>
    %195 = arith.mulf %184, %194 : vector<2x32xf32>
    %196 = arith.addf %193, %195 : vector<2x32xf32>
    %197 = math.tanh %196 : vector<2x32xf32>
    %cst_47 = arith.constant 1.000000e+00 : f32
    %198 = vector.broadcast %cst_47 : f32 to vector<2x32xf32>
    %199 = arith.subf %198, %192 : vector<2x32xf32>
    %200 = arith.mulf %199, %197 : vector<2x32xf32>
    %201 = arith.mulf %192, %171 : vector<2x32xf32>
    %202 = arith.addf %200, %201 : vector<2x32xf32>
    %c6_i32 = arith.constant 6 : i32
    %c2_i32_48 = arith.constant 2 : i32
    %203 = arith.muli %c6_i32, %c2_i32_48 : i32
    %204 = arith.index_cast %203 : i32 to index
    %c0_49 = arith.constant 0 : index
    %205 = vector.load %arg11[%204, %c0_49] : memref<16x96xf32, #tpu.memory_space<vmem>>, vector<2x96xf32>
    %cst_50 = arith.constant dense<0.000000e+00> : vector<2x96xf32>
    %206 = tpu.matmul %202, %12, %cst_50 {dimension_numbers = #tpu.dot_dimension_numbers<[1], [0], [0], [1], [0, 0, 1, 1], [], []>} : vector<2x32xf32>, vector<32x96xf32>, vector<2x96xf32> -> vector<2x96xf32>
    %207 = arith.addf %206, %15 : vector<2x96xf32>
    %208 = vector.extract_strided_slice %205 {offsets = [0, 0], sizes = [2, 32], strides = [1, 1]} : vector<2x96xf32> to vector<2x32xf32>
    %209 = vector.extract_strided_slice %207 {offsets = [0, 0], sizes = [2, 32], strides = [1, 1]} : vector<2x96xf32> to vector<2x32xf32>
    %210 = arith.addf %208, %209 : vector<2x32xf32>
    %211 = arith.negf %210 : vector<2x32xf32>
    %212 = math.exp %211 : vector<2x32xf32>
    %cst_51 = arith.constant 1.000000e+00 : f32
    %213 = vector.broadcast %cst_51 : f32 to vector<2x32xf32>
    %214 = arith.addf %213, %212 : vector<2x32xf32>
    %215 = arith.divf %213, %214 : vector<2x32xf32>
    %216 = vector.extract_strided_slice %205 {offsets = [0, 32], sizes = [2, 32], strides = [1, 1]} : vector<2x96xf32> to vector<2x32xf32>
    %217 = vector.extract_strided_slice %207 {offsets = [0, 32], sizes = [2, 32], strides = [1, 1]} : vector<2x96xf32> to vector<2x32xf32>
    %218 = arith.addf %216, %217 : vector<2x32xf32>
    %219 = arith.negf %218 : vector<2x32xf32>
    %220 = math.exp %219 : vector<2x32xf32>
    %cst_52 = arith.constant 1.000000e+00 : f32
    %221 = vector.broadcast %cst_52 : f32 to vector<2x32xf32>
    %222 = arith.addf %221, %220 : vector<2x32xf32>
    %223 = arith.divf %221, %222 : vector<2x32xf32>
    %224 = vector.extract_strided_slice %205 {offsets = [0, 64], sizes = [2, 32], strides = [1, 1]} : vector<2x96xf32> to vector<2x32xf32>
    %225 = vector.extract_strided_slice %207 {offsets = [0, 64], sizes = [2, 32], strides = [1, 1]} : vector<2x96xf32> to vector<2x32xf32>
    %226 = arith.mulf %215, %225 : vector<2x32xf32>
    %227 = arith.addf %224, %226 : vector<2x32xf32>
    %228 = math.tanh %227 : vector<2x32xf32>
    %cst_53 = arith.constant 1.000000e+00 : f32
    %229 = vector.broadcast %cst_53 : f32 to vector<2x32xf32>
    %230 = arith.subf %229, %223 : vector<2x32xf32>
    %231 = arith.mulf %230, %228 : vector<2x32xf32>
    %232 = arith.mulf %223, %202 : vector<2x32xf32>
    %233 = arith.addf %231, %232 : vector<2x32xf32>
    %c7_i32 = arith.constant 7 : i32
    %c2_i32_54 = arith.constant 2 : i32
    %234 = arith.muli %c7_i32, %c2_i32_54 : i32
    %235 = arith.index_cast %234 : i32 to index
    %c0_55 = arith.constant 0 : index
    %236 = vector.load %arg11[%235, %c0_55] : memref<16x96xf32, #tpu.memory_space<vmem>>, vector<2x96xf32>
    %cst_56 = arith.constant dense<0.000000e+00> : vector<2x96xf32>
    %237 = tpu.matmul %233, %12, %cst_56 {dimension_numbers = #tpu.dot_dimension_numbers<[1], [0], [0], [1], [0, 0, 1, 1], [], []>} : vector<2x32xf32>, vector<32x96xf32>, vector<2x96xf32> -> vector<2x96xf32>
    %238 = arith.addf %237, %15 : vector<2x96xf32>
    %239 = vector.extract_strided_slice %236 {offsets = [0, 0], sizes = [2, 32], strides = [1, 1]} : vector<2x96xf32> to vector<2x32xf32>
    %240 = vector.extract_strided_slice %238 {offsets = [0, 0], sizes = [2, 32], strides = [1, 1]} : vector<2x96xf32> to vector<2x32xf32>
    %241 = arith.addf %239, %240 : vector<2x32xf32>
    %242 = arith.negf %241 : vector<2x32xf32>
    %243 = math.exp %242 : vector<2x32xf32>
    %cst_57 = arith.constant 1.000000e+00 : f32
    %244 = vector.broadcast %cst_57 : f32 to vector<2x32xf32>
    %245 = arith.addf %244, %243 : vector<2x32xf32>
    %246 = arith.divf %244, %245 : vector<2x32xf32>
    %247 = vector.extract_strided_slice %236 {offsets = [0, 32], sizes = [2, 32], strides = [1, 1]} : vector<2x96xf32> to vector<2x32xf32>
    %248 = vector.extract_strided_slice %238 {offsets = [0, 32], sizes = [2, 32], strides = [1, 1]} : vector<2x96xf32> to vector<2x32xf32>
    %249 = arith.addf %247, %248 : vector<2x32xf32>
    %250 = arith.negf %249 : vector<2x32xf32>
    %251 = math.exp %250 : vector<2x32xf32>
    %cst_58 = arith.constant 1.000000e+00 : f32
    %252 = vector.broadcast %cst_58 : f32 to vector<2x32xf32>
    %253 = arith.addf %252, %251 : vector<2x32xf32>
    %254 = arith.divf %252, %253 : vector<2x32xf32>
    %255 = vector.extract_strided_slice %236 {offsets = [0, 64], sizes = [2, 32], strides = [1, 1]} : vector<2x96xf32> to vector<2x32xf32>
    %256 = vector.extract_strided_slice %238 {offsets = [0, 64], sizes = [2, 32], strides = [1, 1]} : vector<2x96xf32> to vector<2x32xf32>
    %257 = arith.mulf %246, %256 : vector<2x32xf32>
    %258 = arith.addf %255, %257 : vector<2x32xf32>
    %259 = math.tanh %258 : vector<2x32xf32>
    %cst_59 = arith.constant 1.000000e+00 : f32
    %260 = vector.broadcast %cst_59 : f32 to vector<2x32xf32>
    %261 = arith.subf %260, %254 : vector<2x32xf32>
    %262 = arith.mulf %261, %259 : vector<2x32xf32>
    %263 = arith.mulf %254, %233 : vector<2x32xf32>
    %264 = arith.addf %262, %263 : vector<2x32xf32>
    %c8_i32 = arith.constant 8 : i32
    %c0_60 = arith.constant 0 : index
    %c0_61 = arith.constant 0 : index
    %265 = vector.load %arg6[%c0_60, %c0_61] : memref<32x128xf32, #tpu.memory_space<vmem>>, vector<32x128xf32>
    %cst_62 = arith.constant dense<0.000000e+00> : vector<2x128xf32>
    %266 = tpu.matmul %264, %265, %cst_62 {dimension_numbers = #tpu.dot_dimension_numbers<[1], [0], [0], [1], [0, 0, 1, 1], [], []>} : vector<2x32xf32>, vector<32x128xf32>, vector<2x128xf32> -> vector<2x128xf32>
    %c0_63 = arith.constant 0 : index
    %c0_64 = arith.constant 0 : index
    %267 = vector.load %arg7[%c0_63, %c0_64] : memref<1x128xf32, #tpu.memory_space<vmem>>, vector<1x128xf32>
    %268 = vector.broadcast %267 : vector<1x128xf32> to vector<2x128xf32>
    %269 = arith.addf %266, %268 : vector<2x128xf32>
    %c0_65 = arith.constant 0 : index
    %c0_66 = arith.constant 0 : index
    %270 = vector.load %arg10[%c0_65, %c0_66] : memref<2x128xf32, #tpu.memory_space<vmem>>, vector<2x128xf32>
    tpu.vector_store %arg10[%c0_65, %c0_66], %269 {strides = array<i32>} : memref<2x128xf32, #tpu.memory_space<vmem>>, vector<2x128xf32>,
    %c0_67 = arith.constant 0 : index
    %c0_68 = arith.constant 0 : index
    %271 = vector.load %arg1[%c0_67, %c0_68] : memref<2x1xi32, #tpu.memory_space<vmem>>, vector<2x1xi32>
    %272 = tpu.iota {dimensions = array<i32: 1>} : vector<2x128xi32>
    %273 = vector.broadcast %271 : vector<2x1xi32> to vector<2x128xi32>
    %274 = arith.cmpi eq, %273, %272 : vector<2x128xi32>
    %275 = arith.extui %274 : vector<2x128xi1> to vector<2x128xi32>
    %276 = arith.sitofp %275 : vector<2x128xi32> to vector<2x128xf32>
    %cst_69 = arith.constant dense<0xFF800000> : vector<2xf32>
    %277 = vector.multi_reduction <maximumf>, %269, %cst_69 [1] : vector<2x128xf32> to vector<2xf32>
    %278 = vector.shape_cast %277 : vector<2xf32> to vector<2x1xf32>
    %279 = vector.broadcast %278 : vector<2x1xf32> to vector<2x128xf32>
    %280 = arith.subf %269, %279 : vector<2x128xf32>
    %281 = math.exp %280 : vector<2x128xf32>
    %cst_70 = arith.constant dense<0.000000e+00> : vector<2xf32>
    %282 = vector.multi_reduction <add>, %281, %cst_70 [1] : vector<2x128xf32> to vector<2xf32>
    %283 = vector.shape_cast %282 : vector<2xf32> to vector<2x1xf32>
    %284 = math.log %283 : vector<2x1xf32>
    %285 = arith.addf %278, %284 : vector<2x1xf32>
    %286 = arith.mulf %269, %276 : vector<2x128xf32>
    %cst_71 = arith.constant dense<0.000000e+00> : vector<2xf32>
    %287 = vector.multi_reduction <add>, %286, %cst_71 [1] : vector<2x128xf32> to vector<2xf32>
    %288 = vector.shape_cast %287 : vector<2xf32> to vector<2x1xf32>
    %289 = arith.subf %285, %288 : vector<2x1xf32>
    %cst_72 = arith.constant dense<0.000000e+00> : vector<1xf32>
    %290 = vector.multi_reduction <add>, %289, %cst_72 [0] : vector<2x1xf32> to vector<1xf32>
    %291 = vector.shape_cast %290 : vector<1xf32> to vector<1x1xf32>
    %cst_73 = arith.constant 5.000000e-01 : f32
    %292 = vector.broadcast %cst_73 : f32 to vector<1x1xf32>
    %293 = arith.mulf %291, %292 : vector<1x1xf32>
    %c0_74 = arith.constant 0 : index
    %c0_75 = arith.constant 0 : index
    %294 = vector.load %arg8[%c0_74, %c0_75] : memref<1x1xf32, #tpu.memory_space<vmem>>, vector<1x1xf32>
    tpu.vector_store %arg8[%c0_74, %c0_75], %293 {strides = array<i32>} : memref<1x1xf32, #tpu.memory_space<vmem>>, vector<1x1xf32>,
    %295 = arith.sitofp %272 : vector<2x128xi32> to vector<2x128xf32>
    %296 = vector.broadcast %278 : vector<2x1xf32> to vector<2x128xf32>
    %297 = arith.cmpf oeq, %269, %296 : vector<2x128xf32>
    %cst_76 = arith.constant 1.280000e+02 : f32
    %298 = vector.broadcast %cst_76 : f32 to vector<2x128xf32>
    %299 = arith.select %297, %295, %298 : vector<2x128xi1>, vector<2x128xf32>
    %cst_77 = arith.constant dense<0x7F800000> : vector<2xf32>
    %300 = vector.multi_reduction <minimumf>, %299, %cst_77 [1] : vector<2x128xf32> to vector<2xf32>
    %301 = vector.shape_cast %300 : vector<2xf32> to vector<2x1xf32>
    %302 = arith.sitofp %271 : vector<2x1xi32> to vector<2x1xf32>
    %303 = arith.cmpf oeq, %301, %302 : vector<2x1xf32>
    %304 = arith.extui %303 : vector<2x1xi1> to vector<2x1xi32>
    %305 = arith.sitofp %304 : vector<2x1xi32> to vector<2x1xf32>
    %cst_78 = arith.constant dense<0.000000e+00> : vector<1xf32>
    %306 = vector.multi_reduction <add>, %305, %cst_78 [0] : vector<2x1xf32> to vector<1xf32>
    %307 = vector.shape_cast %306 : vector<1xf32> to vector<1x1xf32>
    %cst_79 = arith.constant 5.000000e-01 : f32
    %308 = vector.broadcast %cst_79 : f32 to vector<1x1xf32>
    %309 = arith.mulf %307, %308 : vector<1x1xf32>
    %c0_80 = arith.constant 0 : index
    %c0_81 = arith.constant 0 : index
    %310 = vector.load %arg9[%c0_80, %c0_81] : memref<1x1xf32, #tpu.memory_space<vmem>>, vector<1x1xf32>
    tpu.vector_store %arg9[%c0_80, %c0_81], %309 {strides = array<i32>} : memref<1x1xf32, #tpu.memory_space<vmem>>, vector<1x1xf32>,
    return
  }
}

</mosaic_0001>

<bundles_post_ra>
// kernel: rnnmodel_forward.1
= control target key start
LH: loop header
LB: loop body
LE: loop exit
PB: predicated region body
PF: predicated region fallthrough
CT: control target
= control target key end

     0   :  { %16 = vsyncpa [#allocation4], 0  ;;  %v922_v3 = vmov 0   ;;  %s1198_s0 = inlined_call_operand.vmem [shape: s32[16,1], index: 0, kind: input, shape index: {}]   ;;  %s1199_s1 = inlined_call_operand.vmem [shape: s32[2,1], index: 1, kind: input, shape index: {}]   ;;  %s1200_s2 = inlined_call_operand.vmem [shape: f32[128,96], index: 2, kind: input, shape index: {}]   ;;  %s1201_s3 = inlined_call_operand.vmem [shape: f32[1,96], index: 3, kind: input, shape index: {}]   ;;  %s1202_s4 = inlined_call_operand.vmem [shape: f32[32,96], index: 4, kind: input, shape index: {}]   ;;  %s1203_s5 = inlined_call_operand.vmem [shape: f32[1,96], index: 5, kind: input, shape index: {}]   ;;  %s1204_s6 = inlined_call_operand.vmem [shape: f32[32,128], index: 6, kind: input, shape index: {}]   ;;  %s1205_s7 = inlined_call_operand.vmem [shape: f32[1,128], index: 7, kind: input, shape index: {}]   ;;  %s1206_s8 = inlined_call_operand.hbm [shape: f32[1,1], index: 8, kind: output, shape index: {0}]   ;;  %s1207_s9 = inlined_call_operand.hbm [shape: f32[1,1], index: 9, kind: output, shape index: {1}]   ;;  %s1208_s10 = inlined_call_operand.hbm [shape: f32[2,128], index: 10, kind: output, shape index: {2}]  }
   0x1   :  { %v34_v0 = vld [vmem:[%s1198_s0] sm:$0xff]  ;;  %v991_v1 = vld [vmem:[%s1202_s4 + $0x18] sm:$0xff]  ;;  %v996_v2 = vld [vmem:[%s1202_s4 + $0x10] sm:$0xff]  ;;  %789 = vset.pattern.permute.xlu0 %v922_v3 }
   0x2   :  { %121 = vmatpush.msra.mxu1 %v991_v1  ;;  %v65_v4 = vld [vmem:[%s1200_s2 + $0x78] sm:$0xff]  ;;  %39 = vperm.xlu0 %789, %v34_v0   ;;  %v1005_v5 = vld [vmem:[%s1202_s4 + $0x8] sm:$0xff]  ;;  %v64_v6 = vld [vmem:[%s1200_s2 + $0x70] sm:$0xff] }
   0x3   :  { %70 = vmatpush.msra.mxu0 %v65_v4  ;;  %v63_v7 = vld [vmem:[%s1200_s2 + $0x68] sm:$0xff]  ;;  %186 = vmatpush.msra.mxu2 %v991_v1  ;;  %v1018_v8 = vld [vmem:[%s1202_s4] sm:$0xff]  ;;  %v61_v10 = vld [vmem:[%s1200_s2 + $0x58] sm:$0xff] }
   0x4   :  { %122 = vmatpush.msra.mxu1 %v996_v2  ;;  %251 = vmatpush.msra.mxu3 %v991_v1  ;;  %v62_v9 = vld [vmem:[%s1200_s2 + $0x60] sm:$0xff] }
   0x5   :  { %71 = vmatpush.msra.mxu0 %v64_v6  ;;  %187 = vmatpush.msra.mxu2 %v996_v2 }
   0x6   :  { %123 = vmatpush.msra.mxu1 %v1005_v5  ;;  %252 = vmatpush.msra.mxu3 %v996_v2 }
   0x7   :  { %72 = vmatpush.msra.mxu0 %v63_v7  ;;  %188 = vmatpush.msra.mxu2 %v1005_v5 }
   0x8   :  { %124 = vmatpush.msra.mxu1 %v1018_v8 }
   0x9   :  { %17 = vsyncpa [#allocation6], 0  ;;  %v923_v11 = vmov 0.0   ;;  %73 = vmatpush.msra.mxu0 %v62_v9  ;;  %v60_v12 = vld [vmem:[%s1200_s2 + $0x50] sm:$0xff]  ;;  %189 = vmatpush.msra.mxu2 %v1018_v8  ;;  %v59_v13 = vld [vmem:[%s1200_s2 + $0x48] sm:$0xff]  ;;  %v36_v23 = vlaneseq  ;;  %v924_v26 = vmov 1.0  }
   0xa   :  { %125 = vmatmul.f32.vlgmr.msra.gmra.mxu1 %v923_v11  ;;  %253 = vmatpush.msra.mxu3 %v1005_v5  ;;  %v58_v14 = vld [vmem:[%s1200_s2 + $0x40] sm:$0xff]  ;;  %v57_v15 = vld [vmem:[%s1200_s2 + $0x38] sm:$0xff]  ;;  %v56_v16 = vld [vmem:[%s1200_s2 + $0x30] sm:$0xff]  ;;  %s925_s15 = smov 64   ;;  %vm93_vm1 = vcmask 785408   ;;  %vm105_vm6 = vcmask 261120  }
   0xb   :  { %74 = vmatpush.msra.mxu0 %v61_v10  ;;  %316 = vmatpush.msrb.mxu1 %v991_v1  ;;  %v55_v17 = vld [vmem:[%s1200_s2 + $0x28] sm:$0xff]  ;;  %v54_v18 = vld [vmem:[%s1200_s2 + $0x20] sm:$0xff]  ;;  %v53_v19 = vld [vmem:[%s1200_s2 + $0x18] sm:$0xff]  ;;  %v1085_v24 = vand.u32 127, %v36_v23  ;;  %s730_s30 = sshll.u32 %s1207_s9, 4  ;;  %s928_s11 = smov [#allocation7]   ;;  %s731_s30 = int_to_ptr.hbm [resolvable:$true] %s730_s30 }
   0xc   :  { %254 = vmatpush.msra.mxu3 %v1018_v8  ;;  %790 = vset.pattern.permute.xlu2 %v922_v3  ;;  %v52_v20 = vld [vmem:[%s1200_s2 + $0x10] sm:$0xff]  ;;  %v51_v21 = vld [vmem:[%s1200_s2 + $0x8] sm:$0xff]  ;;  %v50_v22 = vld [vmem:[%s1200_s2] sm:$0xff]  ;;  %s739_s12 = sshll.u32 %s928_s11, 4  ;;  %s741_s14 = sshll.u32 %s1208_s10, 4  ;;  %s740_s12 = int_to_ptr.vmem [resolvable:$true] %s739_s12  ;;  %s742_s14 = int_to_ptr.hbm [resolvable:$true] %s741_s14 }
   0xd   :  { %75 = vmatpush.msra.mxu0 %v60_v12  ;;  %317 = vmatpush.msrb.mxu1 %v996_v2  ;;  %v1092_v27 = vld [vmem:[%s1203_s5] ss:$0 sm:$0xff]  ;;  %s929_s9 = smov [#allocation3]   ;;  %s719_s16 = sshll.u32 %s1206_s8, 4  ;;  %s720_s16 = int_to_ptr.hbm [resolvable:$true] %s719_s16 }
   0xe   :  { %381 = vmatpush.msrb.mxu2 %v991_v1  ;;  %446 = vmatpush.msrb.mxu3 %v991_v1  ;;  %v1099_v30 = vld [vmem:[%s1201_s3] ss:$0 sm:$0xff]  ;;  %s926_s3 = smov 96   ;;  %s717_s10 = sshll.u32 %s929_s9, 4  ;;  %s718_s10 = int_to_ptr.vmem [resolvable:$true] %s717_s10 }
   0xf   :  { %76 = vmatpush.msra.mxu0 %v59_v13  ;;  %318 = vmatpush.msrb.mxu1 %v1005_v5 }
  0x10   :  { %382 = vmatpush.msrb.mxu2 %v996_v2  ;;  %447 = vmatpush.msrb.mxu3 %v996_v2 }
  0x11   :  { %77 = vmatpush.msra.mxu0 %v58_v14  ;;  %319 = vmatpush.msrb.mxu1 %v1018_v8 }
  0x12   :  { %383 = vmatpush.msrb.mxu2 %v1005_v5  ;;  %448 = vmatpush.msrb.mxu3 %v1005_v5 }
  0x13   :  { %78 = vmatpush.msra.mxu0 %v57_v15  ;;  %511 = vmatpush.msra.mxu1 %v991_v1 }
  0x14   :  { %384 = vmatpush.msrb.mxu2 %v1018_v8  ;;  %449 = vmatpush.msrb.mxu3 %v1018_v8 }
  0x15   :  { %79 = vmatpush.msra.mxu0 %v56_v16  ;;  %512 = vmatpush.msra.mxu1 %v996_v2 }
  0x17   :  { %80 = vmatpush.msra.mxu0 %v55_v17  ;;  %513 = vmatpush.msra.mxu1 %v1005_v5 }
  0x19   :  { %81 = vmatpush.msra.mxu0 %v54_v18  ;;  %514 = vmatpush.msra.mxu1 %v1018_v8 }
  0x1b   :  { %82 = vmatpush.msra.mxu0 %v53_v19 }
  0x1d   :  { %83 = vmatpush.msra.mxu0 %v52_v20 }
  0x1f   :  { %84 = vmatpush.msra.mxu0 %v51_v21 }
  0x21   :  { %85 = vmatpush.msra.mxu0 %v50_v22 }
  0x74   :  { %v40_v25 = vpop.permute.xlu0 %39 }
  0x75   :  { %vm44_vm0 = vcmp.eq.s32.totalorder %v40_v25, %v1085_v24 }
  0x76   :  { %761 = vmatmul.msk.f32.vlgmr.msra.gmra.mxu0 %vm44_vm0, %v924_v26 }
  0x87   :  { %v126_v28 = vpop.f32.mrf.mxu1 }
  0x88   :  { %v127_v29 = vadd.f32 %v1092_v27, %v126_v28 }
  0x8a   :  { %150 = vrot.lane.b32.xlu0 %v127_v29, %s925_s15 }
  0xf3   :  { %v87_v31 = vpop.f32.mrf.mxu0 }
  0xf4   :  { %v88_v32 = vadd.f32 %v1099_v30, %v87_v31 }
  0xf6   :  { %94 = vst.msk [vmem:[#allocation2] sm:$0xff] %vm93_vm1, %v88_v32 }
  0xfc   :  { %v151_v46 = vpop.permute.xlu0 %150 }
  0xfd   :  { %v104_v33 = vld [vmem:[#allocation2] sm:$0x3]  ;;  %v168_v61 = vld [vmem:[#allocation2 + $0x2] sm:$0x3] }
  0xfe   :  { %v129_v34 = vadd.f32 %v127_v29, %v104_v33  ;;  %v233_v29 = vld [vmem:[#allocation2 + $0x4] sm:$0x3] }
 0x100   :  { %v763_v35 = vmul.f32 -1.442695, %v129_v34 }
 0x102   :  { %794 = vpow2.f32 %v763_v35 }
 0x108   :  { %v795_v36 = vpop.eup %794 }
 0x109   :  { %v133_v37 = vadd.f32 1.0, %v795_v36 }
 0x10b   :  { %796 = vrcp.f32 %v133_v37  ;;  %v145_v41 = vand.u32 2147483648, %v133_v37  ;;  %v143_v43 = vand.u32 2147483647, %v133_v37  ;;  %vm139_vm3 = vweird.f32 %v133_v37 }
 0x10d   :  { %v146_v45 = vor.u32 1.1754944e-38, %v145_v41  ;;  %vm144_vm5 = vcmp.eq.f32.partialorder %v143_v43, 8.507059e+37 }
 0x111   :  { %v797_v38 = vpop.eup %796 }
 0x112   :  { %v135_v39 = vmul.f32 %v797_v38, %v133_v37  ;;  %vm140_vm2 = vweird.f32 %v797_v38 }
 0x113   :  { %vm141_vm4 = vmor %vm139_vm3, %vm140_vm2 }
 0x114   :  { %v136_v40 = vsub.f32 1.0, %v135_v39 }
 0x116   :  { %v137_v42 = vmul.f32 %v797_v38, %v136_v40 }
 0x118   :  { %v138_v44 = vadd.f32 %v797_v38, %v137_v42 }
 0x11a   :  { %v142_v47 = vsel %vm141_vm4, %v797_v38, %v138_v44 }
 0x11b   :  { %v147_v48 = vsel %vm144_vm5, %v146_v45, %v142_v47 }
 0x11c   :  { %v153_v49 = vmul.f32 %v151_v46, %v147_v48  ;;  %v160_v53 = vsub.f32 1.0, %v147_v48  ;;  %v166_v56 = vmul.f32 0.0, %v147_v48 }
 0x11e   :  { %155 = vrot.lane.b32.xlu1 %v153_v49, %s925_s15 }
 0x190   :  { %v156_v50 = vpop.permute.xlu1 %155 }
 0x191   :  { %v158_v51 = vadd.f32 %v156_v50, %v104_v33 }
 0x193   :  { %798 = vtanh.f32 %v158_v51 }
 0x199   :  { %v799_v52 = vpop.eup %798 }
 0x19a   :  { %162 = vrot.lane.b32.xlu1 %v799_v52, %s926_s3 }
 0x20c   :  { %v163_v54 = vpop.permute.xlu1 %162 }
 0x20d   :  { %v165_v55 = vmul.f32 %v163_v54, %v160_v53 }
 0x20f   :  { %v167_v57 = vadd.f32 %v166_v56, %v165_v55 }
 0x211   :  { %170 = vrot.lane.b32.xlu2 %v167_v57, %s926_s3 }
 0x26b   :  { %v171_v58 = vpop.permute.xlu2 %170 }
 0x26c   :  { %764 = vmatmul.msk.f32.vlgmr.msra.gmra.mxu2 %vm105_vm6, %v171_v58  ;;  %v298_v58 = vld [vmem:[#allocation2 + $0x6] sm:$0x3] }
 0x26d   :  { %576 = vmatpush.msra.mxu2 %v991_v1 }
 0x26f   :  { %577 = vmatpush.msra.mxu2 %v996_v2 }
 0x271   :  { %578 = vmatpush.msra.mxu2 %v1005_v5 }
 0x273   :  { %579 = vmatpush.msra.mxu2 %v1018_v8 }
 0x2ef   :  { %v191_v59 = vpop.f32.mrf.mxu2 }
 0x2f0   :  { %v192_v60 = vadd.f32 %v1092_v27, %v191_v59 }
 0x2f2   :  { %215 = vrot.lane.b32.xlu2 %v192_v60, %s925_s15  ;;  %v194_v62 = vadd.f32 %v192_v60, %v168_v61 }
 0x2f4   :  { %v765_v63 = vmul.f32 -1.442695, %v194_v62 }
 0x2f6   :  { %800 = vpow2.f32 %v765_v63 }
 0x2fc   :  { %v801_v0 = vpop.eup %800 }
 0x2fd   :  { %v198_v3 = vadd.f32 1.0, %v801_v0 }
 0x2ff   :  { %802 = vrcp.f32 %v198_v3  ;;  %v210_v5 = vand.u32 2147483648, %v198_v3  ;;  %vm204_vm8 = vweird.f32 %v198_v3  ;;  %v208_v8 = vand.u32 2147483647, %v198_v3 }
 0x301   :  { %v211_v10 = vor.u32 1.1754944e-38, %v210_v5  ;;  %vm209_vm10 = vcmp.eq.f32.partialorder %v208_v8, 8.507059e+37 }
 0x305   :  { %v803_v4 = vpop.eup %802 }
 0x306   :  { %v200_v1 = vmul.f32 %v803_v4, %v198_v3  ;;  %vm205_vm7 = vweird.f32 %v803_v4 }
 0x307   :  { %vm206_vm9 = vmor %vm204_vm8, %vm205_vm7 }
 0x308   :  { %v201_v6 = vsub.f32 1.0, %v200_v1 }
 0x30a   :  { %v202_v2 = vmul.f32 %v803_v4, %v201_v6 }
 0x30c   :  { %v203_v7 = vadd.f32 %v803_v4, %v202_v2 }
 0x30e   :  { %v207_v9 = vsel %vm206_vm9, %v803_v4, %v203_v7 }
 0x30f   :  { %v212_v13 = vsel %vm209_vm10, %v211_v10, %v207_v9 }
 0x310   :  { %v225_v18 = vsub.f32 1.0, %v212_v13  ;;  %v231_v20 = vmul.f32 %v212_v13, %v167_v57 }
 0x34c   :  { %v216_v12 = vpop.permute.xlu2 %215 }
 0x34d   :  { %v218_v14 = vmul.f32 %v216_v12, %v212_v13 }
 0x34f   :  { %220 = vrot.lane.b32.xlu0 %v218_v14, %s925_s15 }
 0x3c1   :  { %v221_v15 = vpop.permute.xlu0 %220 }
 0x3c2   :  { %v223_v16 = vadd.f32 %v221_v15, %v168_v61  ;;  %v35_v15 = vld [vmem:[%s1198_s0 + $0x8] sm:$0xff] }
 0x3c4   :  { %804 = vtanh.f32 %v223_v16 }
 0x3ca   :  { %v805_v17 = vpop.eup %804 }
 0x3cb   :  { %227 = vrot.lane.b32.xlu1 %v805_v17, %s926_s3 }
 0x43d   :  { %v228_v19 = vpop.permute.xlu1 %227 }
 0x43e   :  { %v230_v21 = vmul.f32 %v228_v19, %v225_v18 }
 0x440   :  { %v232_v22 = vadd.f32 %v231_v20, %v230_v21 }
 0x442   :  { %235 = vrot.lane.b32.xlu2 %v232_v22, %s926_s3 }
 0x49c   :  { %v236_v23 = vpop.permute.xlu2 %235 }
 0x49d   :  { %766 = vmatmul.msk.f32.vlgmr.msra.gmra.mxu3 %vm105_vm6, %v236_v23 }
 0x520   :  { %v256_v25 = vpop.f32.mrf.mxu3 }
 0x521   :  { %v257_v28 = vadd.f32 %v1092_v27, %v256_v25 }
 0x523   :  { %280 = vrot.lane.b32.xlu0 %v257_v28, %s925_s15  ;;  %v259_v31 = vadd.f32 %v257_v28, %v233_v29 }
 0x525   :  { %v767_v32 = vmul.f32 -1.442695, %v259_v31 }
 0x527   :  { %806 = vpow2.f32 %v767_v32 }
 0x52d   :  { %v807_v33 = vpop.eup %806 }
 0x52e   :  { %v263_v34 = vadd.f32 1.0, %v807_v33 }
 0x530   :  { %808 = vrcp.f32 %v263_v34  ;;  %v275_v40 = vand.u32 2147483648, %v263_v34  ;;  %vm269_vm12 = vweird.f32 %v263_v34  ;;  %v273_v41 = vand.u32 2147483647, %v263_v34 }
 0x532   :  { %v276_v43 = vor.u32 1.1754944e-38, %v275_v40  ;;  %vm274_vm14 = vcmp.eq.f32.partialorder %v273_v41, 8.507059e+37 }
 0x536   :  { %v809_v35 = vpop.eup %808 }
 0x537   :  { %v265_v36 = vmul.f32 %v809_v35, %v263_v34  ;;  %vm270_vm11 = vweird.f32 %v809_v35 }
 0x538   :  { %vm271_vm13 = vmor %vm269_vm12, %vm270_vm11 }
 0x539   :  { %v266_v37 = vsub.f32 1.0, %v265_v36 }
 0x53b   :  { %v267_v38 = vmul.f32 %v809_v35, %v266_v37 }
 0x53d   :  { %v268_v39 = vadd.f32 %v809_v35, %v267_v38 }
 0x53f   :  { %v272_v42 = vsel %vm271_vm13, %v809_v35, %v268_v39 }
 0x540   :  { %v277_v45 = vsel %vm274_vm14, %v276_v43, %v272_v42 }
 0x541   :  { %v290_v50 = vsub.f32 1.0, %v277_v45  ;;  %v296_v52 = vmul.f32 %v277_v45, %v232_v22 }
 0x595   :  { %v281_v44 = vpop.permute.xlu0 %280 }
 0x596   :  { %v283_v46 = vmul.f32 %v281_v44, %v277_v45 }
 0x598   :  { %285 = vrot.lane.b32.xlu1 %v283_v46, %s925_s15 }
 0x60a   :  { %v286_v47 = vpop.permute.xlu1 %285 }
 0x60b   :  { %v288_v48 = vadd.f32 %v286_v47, %v233_v29 }
 0x60d   :  { %810 = vtanh.f32 %v288_v48 }
 0x613   :  { %v811_v49 = vpop.eup %810 }
 0x614   :  { %292 = vrot.lane.b32.xlu2 %v811_v49, %s926_s3 }
 0x66e   :  { %v293_v51 = vpop.permute.xlu2 %292 }
 0x66f   :  { %v295_v53 = vmul.f32 %v293_v51, %v290_v50 }
 0x671   :  { %v297_v54 = vadd.f32 %v296_v52, %v295_v53 }
 0x673   :  { %300 = vrot.lane.b32.xlu0 %v297_v54, %s926_s3 }
 0x6e5   :  { %v301_v55 = vpop.permute.xlu0 %300 }
 0x6e6   :  { %768 = vmatmul.msk.f32.vlgmr.msrb.gmra.mxu1 %vm105_vm6, %v301_v55 }
 0x763   :  { %v321_v56 = vpop.f32.mrf.mxu1 }
 0x764   :  { %v322_v57 = vadd.f32 %v1092_v27, %v321_v56 }
 0x766   :  { %345 = vrot.lane.b32.xlu1 %v322_v57, %s925_s15  ;;  %v324_v59 = vadd.f32 %v322_v57, %v298_v58 }
 0x768   :  { %v769_v60 = vmul.f32 -1.442695, %v324_v59 }
 0x76a   :  { %812 = vpow2.f32 %v769_v60 }
 0x770   :  { %v813_v61 = vpop.eup %812 }
 0x771   :  { %v328_v62 = vadd.f32 1.0, %v813_v61 }
 0x773   :  { %814 = vrcp.f32 %v328_v62  ;;  %v340_v6 = vand.u32 2147483648, %v328_v62  ;;  %vm334_vm0 = vweird.f32 %v328_v62  ;;  %v338_v2 = vand.u32 2147483647, %v328_v62 }
 0x775   :  { %v341_v5 = vor.u32 1.1754944e-38, %v340_v6  ;;  %vm339_vm3 = vcmp.eq.f32.partialorder %v338_v2, 8.507059e+37 }
 0x779   :  { %v815_v63 = vpop.eup %814 }
 0x77a   :  { %v330_v0 = vmul.f32 %v815_v63, %v328_v62  ;;  %vm335_vm15 = vweird.f32 %v815_v63 }
 0x77b   :  { %vm336_vm2 = vmor %vm334_vm0, %vm335_vm15 }
 0x77c   :  { %v331_v3 = vsub.f32 1.0, %v330_v0 }
 0x77e   :  { %v332_v4 = vmul.f32 %v815_v63, %v331_v3 }
 0x780   :  { %v333_v1 = vadd.f32 %v815_v63, %v332_v4 }
 0x782   :  { %v337_v7 = vsel %vm336_vm2, %v815_v63, %v333_v1 }
 0x783   :  { %v342_v9 = vsel %vm339_vm3, %v341_v5, %v337_v7 }
 0x784   :  { %v355_v16 = vsub.f32 1.0, %v342_v9  ;;  %v361_v18 = vmul.f32 %v342_v9, %v297_v54 }
 0x7d8   :  { %v346_v8 = vpop.permute.xlu1 %345 }
 0x7d9   :  { %v348_v10 = vmul.f32 %v346_v8, %v342_v9 }
 0x7db   :  { %350 = vrot.lane.b32.xlu2 %v348_v10, %s925_s15 }
 0x7e3   :  { %42 = vperm.xlu2 %790, %v35_v15  }
 0x835   :  { %v351_v12 = vpop.permute.xlu2 %350 }
 0x836   :  { %v353_v13 = vadd.f32 %v351_v12, %v298_v58 }
 0x838   :  { %816 = vtanh.f32 %v353_v13 }
 0x83d   :  { %v43_v21 = vpop.permute.xlu2 %42 }
 0x83e   :  { %v817_v14 = vpop.eup %816  ;;  %vm45_vm4 = vcmp.eq.s32.totalorder %v43_v21, %v1085_v24 }
 0x83f   :  { %357 = vrot.lane.b32.xlu0 %v817_v14, %s926_s3  ;;  %762 = vmatmul.msk.f32.gmra.mxu0 %vm45_vm4, %v924_v26 }
 0x8b1   :  { %v358_v17 = vpop.permute.xlu0 %357 }
 0x8b2   :  { %v360_v19 = vmul.f32 %v358_v17, %v355_v16 }
 0x8b4   :  { %v362_v20 = vadd.f32 %v361_v18, %v360_v19 }
 0x8b6   :  { %365 = vrot.lane.b32.xlu1 %v362_v20, %s926_s3 }
 0x8bc   :  { %v90_v23 = vpop.f32.mrf.mxu0 }
 0x8bd   :  { %v91_v25 = vadd.f32 %v1099_v30, %v90_v23 }
 0x8bf   :  { %95 = vst.msk [vmem:[#allocation2 + $0x8] sm:$0xff] %vm93_vm1, %v91_v25 }
 0x8c6   :  { %v363_v31 = vld [vmem:[#allocation2 + $0x8] sm:$0x3]  ;;  %v428_v57 = vld [vmem:[#allocation2 + $0xa] sm:$0x3] }
 0x928   :  { %v366_v22 = vpop.permute.xlu1 %365 }
 0x929   :  { %770 = vmatmul.msk.f32.vlgmr.msrb.gmra.mxu2 %vm105_vm6, %v366_v22  ;;  %v493_v22 = vld [vmem:[#allocation2 + $0xc] sm:$0x3] }
 0x9ac   :  { %v386_v28 = vpop.f32.mrf.mxu2 }
 0x9ad   :  { %v387_v29 = vadd.f32 %v1092_v27, %v386_v28 }
 0x9af   :  { %410 = vrot.lane.b32.xlu0 %v387_v29, %s925_s15  ;;  %v389_v32 = vadd.f32 %v387_v29, %v363_v31 }
 0x9b1   :  { %v771_v33 = vmul.f32 -1.442695, %v389_v32 }
 0x9b3   :  { %818 = vpow2.f32 %v771_v33 }
 0x9b9   :  { %v819_v34 = vpop.eup %818 }
 0x9ba   :  { %v393_v35 = vadd.f32 1.0, %v819_v34 }
 0x9bc   :  { %820 = vrcp.f32 %v393_v35  ;;  %v405_v30 = vand.u32 2147483648, %v393_v35  ;;  %vm399_vm1 = vweird.f32 %v393_v35  ;;  %v403_v40 = vand.u32 2147483647, %v393_v35 }
 0x9be   :  { %v406_v42 = vor.u32 1.1754944e-38, %v405_v30  ;;  %vm404_vm8 = vcmp.eq.f32.partialorder %v403_v40, 8.507059e+37 }
 0x9c2   :  { %v821_v26 = vpop.eup %820 }
 0x9c3   :  { %v395_v36 = vmul.f32 %v821_v26, %v393_v35  ;;  %vm400_vm5 = vweird.f32 %v821_v26 }
 0x9c4   :  { %vm401_vm7 = vmor %vm399_vm1, %vm400_vm5  ;;  %vm664_vm1 = vcmask 1041408  }
 0x9c5   :  { %v396_v37 = vsub.f32 1.0, %v395_v36 }
 0x9c7   :  { %v397_v38 = vmul.f32 %v821_v26, %v396_v37 }
 0x9c9   :  { %v398_v39 = vadd.f32 %v821_v26, %v397_v38 }
 0x9cb   :  { %v402_v41 = vsel %vm401_vm7, %v821_v26, %v398_v39 }
 0x9cc   :  { %v407_v44 = vsel %vm404_vm8, %v406_v42, %v402_v41  ;;  %vm702_vm8 = vcmask 1024  }
 0x9cd   :  { %v420_v49 = vsub.f32 1.0, %v407_v44  ;;  %v426_v51 = vmul.f32 %v407_v44, %v362_v20 }
 0xa21   :  { %v411_v43 = vpop.permute.xlu0 %410 }
 0xa22   :  { %v413_v45 = vmul.f32 %v411_v43, %v407_v44 }
 0xa24   :  { %415 = vrot.lane.b32.xlu1 %v413_v45, %s925_s15 }
 0xa96   :  { %v416_v46 = vpop.permute.xlu1 %415 }
 0xa97   :  { %v418_v47 = vadd.f32 %v416_v46, %v363_v31 }
 0xa99   :  { %822 = vtanh.f32 %v418_v47 }
 0xa9f   :  { %v823_v48 = vpop.eup %822 }
 0xaa0   :  { %422 = vrot.lane.b32.xlu2 %v823_v48, %s926_s3 }
 0xafa   :  { %v423_v50 = vpop.permute.xlu2 %422 }
 0xafb   :  { %v425_v52 = vmul.f32 %v423_v50, %v420_v49 }
 0xafd   :  { %v427_v53 = vadd.f32 %v426_v51, %v425_v52  ;;  %v558_v52 = vld [vmem:[#allocation2 + $0xe] sm:$0x3] }
 0xaff   :  { %430 = vrot.lane.b32.xlu0 %v427_v53, %s926_s3 }
 0xb71   :  { %v431_v54 = vpop.permute.xlu0 %430 }
 0xb72   :  { %772 = vmatmul.msk.f32.vlgmr.msrb.gmra.mxu3 %vm105_vm6, %v431_v54 }
 0xbf5   :  { %v451_v55 = vpop.f32.mrf.mxu3 }
 0xbf6   :  { %v452_v56 = vadd.f32 %v1092_v27, %v451_v55 }
 0xbf8   :  { %475 = vrot.lane.b32.xlu1 %v452_v56, %s925_s15  ;;  %v454_v58 = vadd.f32 %v452_v56, %v428_v57 }
 0xbfa   :  { %v773_v59 = vmul.f32 -1.442695, %v454_v58 }
 0xbfc   :  { %824 = vpow2.f32 %v773_v59 }
 0xc02   :  { %v825_v60 = vpop.eup %824 }
 0xc03   :  { %v458_v61 = vadd.f32 1.0, %v825_v60 }
 0xc05   :  { %826 = vrcp.f32 %v458_v61  ;;  %v470_v1 = vand.u32 2147483648, %v458_v61  ;;  %vm464_vm10 = vweird.f32 %v458_v61  ;;  %v468_v6 = vand.u32 2147483647, %v458_v61 }
 0xc07   :  { %v471_v7 = vor.u32 1.1754944e-38, %v470_v1  ;;  %vm469_vm12 = vcmp.eq.f32.partialorder %v468_v6, 8.507059e+37 }
 0xc0b   :  { %v827_v62 = vpop.eup %826 }
 0xc0c   :  { %v460_v63 = vmul.f32 %v827_v62, %v458_v61  ;;  %vm465_vm9 = vweird.f32 %v827_v62 }
 0xc0d   :  { %vm466_vm11 = vmor %vm464_vm10, %vm465_vm9  ;;  %vm690_vm10 = vcmask 0  }
 0xc0e   :  { %v461_v0 = vsub.f32 1.0, %v460_v63 }
 0xc10   :  { %v462_v3 = vmul.f32 %v827_v62, %v461_v0 }
 0xc12   :  { %v463_v4 = vadd.f32 %v827_v62, %v462_v3 }
 0xc14   :  { %v467_v2 = vsel %vm466_vm11, %v827_v62, %v463_v4 }
 0xc15   :  { %v472_v8 = vsel %vm469_vm12, %v471_v7, %v467_v2 }
 0xc16   :  { %v485_v14 = vsub.f32 1.0, %v472_v8  ;;  %v491_v16 = vmul.f32 %v472_v8, %v427_v53 }
 0xc6a   :  { %v476_v5 = vpop.permute.xlu1 %475 }
 0xc6b   :  { %v478_v9 = vmul.f32 %v476_v5, %v472_v8  ;;  %v657_v5 = vld [vmem:[%s1199_s1] sm:$0x3]  ;;  %v626_v8 = vld [vmem:[%s1204_s6 + $0x18] sm:$0xff] }
 0xc6c   :  { %648 = vmatpush.msra.mxu3 %v626_v8 }
 0xc6d   :  { %480 = vrot.lane.b32.xlu2 %v478_v9, %s925_s15  ;;  %v625_v9 = vld [vmem:[%s1204_s6 + $0x10] sm:$0xff] }
 0xc6e   :  { %649 = vmatpush.msra.mxu3 %v625_v9 }
 0xcc7   :  { %v481_v10 = vpop.permute.xlu2 %480 }
 0xcc8   :  { %v483_v12 = vadd.f32 %v481_v10, %v428_v57  ;;  %v624_v10 = vld [vmem:[%s1204_s6 + $0x8] sm:$0xff] }
 0xcc9   :  { %650 = vmatpush.msra.mxu3 %v624_v10 }
 0xcca   :  { %828 = vtanh.f32 %v483_v12  ;;  %v623_v12 = vld [vmem:[%s1204_s6] sm:$0xff]  ;;  %s927_s6 = smov [#allocation5]  }
 0xccb   :  { %651 = vmatpush.msra.mxu3 %v623_v12 }
 0xcd0   :  { %v829_v13 = vpop.eup %828 }
 0xcd1   :  { %487 = vrot.lane.b32.xlu0 %v829_v13, %s926_s3 }
 0xd43   :  { %v488_v15 = vpop.permute.xlu0 %487 }
 0xd44   :  { %v490_v17 = vmul.f32 %v488_v15, %v485_v14 }
 0xd46   :  { %v492_v18 = vadd.f32 %v491_v16, %v490_v17 }
 0xd48   :  { %495 = vrot.lane.b32.xlu1 %v492_v18, %s926_s3 }
 0xdba   :  { %v496_v19 = vpop.permute.xlu1 %495 }
 0xdbb   :  { %774 = vmatmul.msk.f32.vlgmr.msra.gmra.mxu1 %vm105_vm6, %v496_v19  ;;  %v793_v19 = vld [vmem:[%s1205_s7] ss:$0 sm:$0xff]  ;;  %s728_s7 = sshll.u32 %s927_s6, 4  ;;  %s729_s7 = int_to_ptr.vmem [resolvable:$true] %s728_s7 }
 0xe38   :  { %v516_v20 = vpop.f32.mrf.mxu1 }
 0xe39   :  { %v517_v21 = vadd.f32 %v1092_v27, %v516_v20 }
 0xe3b   :  { %540 = vrot.lane.b32.xlu2 %v517_v21, %s925_s15  ;;  %v519_v23 = vadd.f32 %v517_v21, %v493_v22 }
 0xe3d   :  { %v775_v25 = vmul.f32 -1.442695, %v519_v23 }
 0xe3f   :  { %830 = vpow2.f32 %v775_v25 }
 0xe45   :  { %v831_v28 = vpop.eup %830 }
 0xe46   :  { %v523_v29 = vadd.f32 1.0, %v831_v28 }
 0xe48   :  { %832 = vrcp.f32 %v523_v29  ;;  %v535_v26 = vand.u32 2147483648, %v523_v29  ;;  %vm529_vm14 = vweird.f32 %v523_v29  ;;  %v533_v36 = vand.u32 2147483647, %v523_v29 }
 0xe4a   :  { %v536_v38 = vor.u32 1.1754944e-38, %v535_v26  ;;  %vm534_vm0 = vcmp.eq.f32.partialorder %v533_v36, 8.507059e+37 }
 0xe4e   :  { %v833_v31 = vpop.eup %832 }
 0xe4f   :  { %v525_v32 = vmul.f32 %v833_v31, %v523_v29  ;;  %vm530_vm13 = vweird.f32 %v833_v31 }
 0xe50   :  { %vm531_vm15 = vmor %vm529_vm14, %vm530_vm13 }
 0xe51   :  { %v526_v33 = vsub.f32 1.0, %v525_v32 }
 0xe53   :  { %v527_v34 = vmul.f32 %v833_v31, %v526_v33 }
 0xe55   :  { %v528_v35 = vadd.f32 %v833_v31, %v527_v34 }
 0xe57   :  { %v532_v37 = vsel %vm531_vm15, %v833_v31, %v528_v35  ;;  %v692_v31 = vcvt.s32.f32 %v1085_v24 }
 0xe58   :  { %v537_v30 = vsel %vm534_vm0, %v536_v38, %v532_v37  ;;  %v698_v38 = vcvt.s32.f32 %v657_v5 }
 0xe59   :  { %v550_v44 = vsub.f32 1.0, %v537_v30  ;;  %v556_v46 = vmul.f32 %v537_v30, %v492_v18 }
 0xe95   :  { %v541_v39 = vpop.permute.xlu2 %540 }
 0xe96   :  { %v543_v40 = vmul.f32 %v541_v39, %v537_v30 }
 0xe98   :  { %545 = vrot.lane.b32.xlu0 %v543_v40, %s925_s15 }
 0xf0a   :  { %v546_v41 = vpop.permute.xlu0 %545 }
 0xf0b   :  { %v548_v42 = vadd.f32 %v546_v41, %v493_v22 }
 0xf0d   :  { %834 = vtanh.f32 %v548_v42 }
 0xf13   :  { %v835_v43 = vpop.eup %834 }
 0xf14   :  { %552 = vrot.lane.b32.xlu1 %v835_v43, %s926_s3 }
 0xf86   :  { %v553_v45 = vpop.permute.xlu1 %552 }
 0xf87   :  { %v555_v47 = vmul.f32 %v553_v45, %v550_v44 }
 0xf89   :  { %v557_v48 = vadd.f32 %v556_v46, %v555_v47 }
 0xf8b   :  { %560 = vrot.lane.b32.xlu2 %v557_v48, %s926_s3 }
 0xfe5   :  { %v561_v49 = vpop.permute.xlu2 %560 }
 0xfe6   :  { %776 = vmatmul.msk.f32.vlgmr.msra.gmra.mxu2 %vm105_vm6, %v561_v49 }
0x1069   :  { %v581_v50 = vpop.f32.mrf.mxu2 }
0x106a   :  { %v582_v51 = vadd.f32 %v1092_v27, %v581_v50 }
0x106c   :  { %605 = vrot.lane.b32.xlu0 %v582_v51, %s925_s15  ;;  %v584_v53 = vadd.f32 %v582_v51, %v558_v52 }
0x106e   :  { %v777_v54 = vmul.f32 -1.442695, %v584_v53 }
0x1070   :  { %836 = vpow2.f32 %v777_v54 }
0x1076   :  { %v837_v55 = vpop.eup %836 }
0x1077   :  { %v588_v56 = vadd.f32 1.0, %v837_v55 }
0x1079   :  { %838 = vrcp.f32 %v588_v56  ;;  %v600_v62 = vand.u32 2147483648, %v588_v56  ;;  %vm594_vm3 = vweird.f32 %v588_v56  ;;  %v598_v63 = vand.u32 2147483647, %v588_v56 }
0x107b   :  { %v601_v0 = vor.u32 1.1754944e-38, %v600_v62  ;;  %vm599_vm5 = vcmp.eq.f32.partialorder %v598_v63, 8.507059e+37 }
0x107f   :  { %v839_v57 = vpop.eup %838 }
0x1080   :  { %v590_v58 = vmul.f32 %v839_v57, %v588_v56  ;;  %vm595_vm2 = vweird.f32 %v839_v57 }
0x1081   :  { %vm596_vm4 = vmor %vm594_vm3, %vm595_vm2 }
0x1082   :  { %v591_v59 = vsub.f32 1.0, %v590_v58 }
0x1084   :  { %v592_v60 = vmul.f32 %v839_v57, %v591_v59 }
0x1086   :  { %v593_v61 = vadd.f32 %v839_v57, %v592_v60 }
0x1088   :  { %v597_v27 = vsel %vm596_vm4, %v839_v57, %v593_v61 }
0x1089   :  { %v602_v4 = vsel %vm599_vm5, %v601_v0, %v597_v27 }
0x108a   :  { %v615_v13 = vsub.f32 1.0, %v602_v4  ;;  %v621_v15 = vmul.f32 %v602_v4, %v557_v48 }
0x10de   :  { %v606_v3 = vpop.permute.xlu0 %605 }
0x10df   :  { %v608_v1 = vmul.f32 %v606_v3, %v602_v4 }
0x10e1   :  { %610 = vrot.lane.b32.xlu1 %v608_v1, %s925_s15 }
0x1153   :  { %v611_v6 = vpop.permute.xlu1 %610 }
0x1154   :  { %v613_v2 = vadd.f32 %v611_v6, %v558_v52 }
0x1156   :  { %840 = vtanh.f32 %v613_v2 }
0x115c   :  { %v841_v7 = vpop.eup %840 }
0x115d   :  { %617 = vrot.lane.b32.xlu2 %v841_v7, %s926_s3 }
0x1165   :  { %659 = vperm.xlu2 %790, %v657_v5  }
0x11b7   :  { %v618_v14 = vpop.permute.xlu2 %617 }
0x11b8   :  { %v620_v16 = vmul.f32 %v618_v14, %v615_v13 }
0x11ba   :  { %v622_v17 = vadd.f32 %v621_v15, %v620_v16 }
0x11bc   :  { %632 = vrot.lane.b32.xlu0 %v622_v17, %s926_s3 }
0x11bf   :  { %v660_v20 = vpop.permute.xlu2 %659 }
0x11c0   :  { %vm661_vm7 = vcmp.eq.s32.totalorder %v660_v20, %v1085_v24 }
0x11c1   :  { %v779_v25 = vsel %vm661_vm7, 1.0, %v923_v11 }
0x122e   :  { %v633_v18 = vpop.permute.xlu0 %632 }
0x122f   :  { %778 = vmatmul.msk.f32.vlgmr.msra.gmra.mxu3 %vm105_vm6, %v633_v18 }
0x12b2   :  { %v653_v21 = vpop.f32.mrf.mxu3 }
0x12b3   :  { %v654_v22 = vadd.f32 %v793_v19, %v653_v21 }
0x12b5   :  { %656 = vst [vmem:[#allocation7] sm:$0x3] %v654_v22  ;;  %v665_v23 = vsel %vm664_vm1, %v654_v22, -inf  ;;  %v677_v28 = vmul.f32 %v779_v25, %v654_v22 }
0x12b6   :  { %666 = vmax.xlane.f32.xlu1 %v665_v23 }
0x12b7   :  { %v678_v29 = vsel %vm664_vm1, %v677_v28, 0.0 }
0x12be   :  { %679 = vadd.xlane.f32.xlu1 %v678_v29 }
0x1329   :  { %v667_v32 = vpop.xlane.xlu1 %666 }
0x132a   :  { %v668_v33 = vsub.f32 %v654_v22, %v667_v32  ;;  %vm693_vm6 = vcmp.eq.f32.partialorder %v654_v22, %v667_v32 }
0x132b   :  { %v694_v34 = vsel %vm693_vm6, %v692_v31, 128.0 }
0x132c   :  { %v669_v35 = vmul.f32 1.442695, %v668_v33  ;;  %v695_v26 = vsel %vm664_vm1, %v694_v34, inf }
0x132d   :  { %696 = vmin.xlane.f32.xlu2 %v695_v26 }
0x132e   :  { %842 = vpow2.f32 %v669_v35 }
0x1331   :  { %v680_v50 = vpop.xlane.xlu1 %679 }
0x1334   :  { %v843_v36 = vpop.eup %842 }
0x1335   :  { %v671_v37 = vsel %vm664_vm1, %v843_v36, 0.0 }
0x1336   :  { %672 = vadd.xlane.f32.xlu0 %v671_v37 }
0x13a0   :  { %v697_v39 = vpop.xlane.xlu2 %696 }
0x13a1   :  { %vm699_vm9 = vcmp.eq.f32.partialorder %v697_v39, %v698_v38 }
0x13a2   :  { %v780_v30 = vsel %vm699_vm9, 1.0, %v923_v11 }
0x13a3   :  { %v703_v24 = vsel %vm702_vm8, %v780_v30, 0.0 }
0x13a4   :  { %v704_v40 = vrot.slane %v703_v24, 4 }
0x13a6   :  { %v705_v41 = vadd.f32 %v704_v40, %v703_v24 }
0x13a8   :  { %v706_v42 = vrot.slane %v705_v41, 2 }
0x13a9   :  { %v673_v43 = vpop.xlane.xlu0 %672 }
0x13aa   :  { %v707_v44 = vadd.f32 %v706_v42, %v705_v41  ;;  %844 = vlog2.f32 %v673_v43 }
0x13ac   :  { %v708_v45 = vrot.slane %v707_v44, 1 }
0x13ae   :  { %v709_v46 = vadd.f32 %v708_v45, %v707_v44 }
0x13b0   :  { %v845_v11 = vpop.eup %844  ;;  %v710_v47 = vmul.f32 0.5, %v709_v46 }
0x13b1   :  { %v675_v48 = vmul.f32 0.6931472, %v845_v11 }
0x13b2   :  { %711 = vst.msk [vmem:[#allocation5] sm:$0x1] %vm690_vm10, %v710_v47 }
0x13b3   :  { %v676_v49 = vadd.f32 %v675_v48, %v667_v32  ;;  %733 = dma.vmem_to_hbm [thread:$0]  %s729_s7, 16, %s731_s30, [#allocation6]  }
0x13b4   :  { %744 = dma.vmem_to_hbm [thread:$0]  %s740_s12, 32, %s742_s14, [#allocation6]  }
0x13b5   :  { %v681_v51 = vsub.f32 %v676_v49, %v680_v50 }
0x13b7   :  { %v682_v52 = vsel %vm664_vm1, %v681_v51, 0.0 }
0x13b8   :  { %v683_v53 = vrot.slane %v682_v52, 4 }
0x13ba   :  { %v684_v54 = vadd.f32 %v683_v53, %v682_v52 }
0x13bc   :  { %v685_v55 = vrot.slane %v684_v54, 2 }
0x13be   :  { %v686_v56 = vadd.f32 %v685_v55, %v684_v54 }
0x13c0   :  { %v687_v57 = vrot.slane %v686_v56, 1 }
0x13c2   :  { %v688_v58 = vadd.f32 %v687_v57, %v686_v56 }
0x13c4   :  { %v689_v59 = vmul.f32 0.5, %v688_v58 }
0x13c6   :  { %691 = vst.msk [vmem:[#allocation3] sm:$0x1] %vm690_vm10, %v689_v59 }
0x13c7   :  { %722 = dma.vmem_to_hbm [thread:$0]  %s718_s10, 16, %s720_s16, [#allocation4]  }
0x13c8   :  { %918 = dma.done.wait [#allocation4], 16  }
0x13c9   :  { %919 = vsyncadd [#allocation4], 4294967280 }
0x13ca   :  { %920 = dma.done.wait [#allocation6], 48  }
0x13cb   :  { %921 = vsyncadd [#allocation6], 4294967248 }
0x13cc   :  { %757 = vsyncpa [#allocation4], 1 }
0x13cd   :  { %758 = vsyncpa [#allocation6], 1 }

</bundles_post_ra>
